<compile_context>
chip_gen: v5e
topology: v5e:2x2
jax: 0.10.0
libtpu: 0.0.40
codegen_flags: <defaults>
</compile_context>

<pallas_src>
import numpy as np
import jax
import jax.numpy as jnp
from jax.experimental import pallas as pl
from jax.experimental.pallas import tpu as pltpu

IN_SIZES = [2, 4, 8, 16, 32, 64, 128]     # per-layer input features
OUT_SIZES = [2 * x for x in IN_SIZES]     # per-layer output features
NUM_LAYERS = len(IN_SIZES)

K_MID = 32       # padded contraction width for layers 2..4 (fin = 8, 16, 32)
N_MID = 128      # padded output width for layers 1..4  (fout <= 128)
K_L5 = 64        # layer 5: fin = 64 (no padding)
N_L5 = 128       # layer 5: fout = 128 (no padding)
K_LAST = 128     # layer 6: fin = 128
N_LAST = 256     # layer 6: fout = 256


def _mlp_chain_kernel(x_s, w0_s, b0_s, wmid_ref, bmid_ref,
                      w5_ref, b5_ref, wl_ref, bl_ref, o_ref):
    """Shapes:
      x_s  : SMEM (2,)        raw input scalars
      w0_s : SMEM (8,)        layer-0 weight, (in, out) row-major: w0_s[in*4+out]
      b0_s : SMEM (4,)        layer-0 bias
      wmid : VMEM (4,32,128)  layers 1..4, stored (in, out), zero padded
      bmid : VMEM (4,128)     layers 1..4 biases, zero padded
      w5   : VMEM (64,128)    layer 5 (in, out)
      b5   : VMEM (1,128)
      wl   : VMEM (128,256)   layer 6 (in, out), pre-scaled by 2 (x2 fold)
      bl   : VMEM (1,256)     pre-scaled by 2
      o    : VMEM (1,256)
    """
    # --- layer 0 (2 -> 4) on the scalar unit: four scalar MACs ----------------
    x0 = x_s[0]
    x1 = x_s[1]
    a1 = [x0 * w0_s[j] + x1 * w0_s[4 + j] + b0_s[j]
          for j in range(OUT_SIZES[0])]                       # 4 scalars

    # --- layer 1 (4 -> 8) on the VPU: scalar-broadcast MACs vs weight rows ----
    w1_rows = wmid_ref[0]                                     # (32, 128); rows 0..3 real
    o = bmid_ref[0:1, :]                                      # (1, 128)
    for k in range(IN_SIZES[1]):
        o = o + a1[k] * w1_rows[k:k + 1, :]

    # --- layers 2..4 on the MXU, K sliced to 32 (zero padding keeps it exact) -
    for idx in range(1, 4):
        o = jnp.dot(o[:, :K_MID], wmid_ref[idx],
                    preferred_element_type=jnp.float32) + bmid_ref[idx:idx + 1, :]

    # --- layer 5: (1,64) x (64,128) --------------------------------------------
    o = jnp.dot(o[:, :K_L5], w5_ref[...],
                preferred_element_type=jnp.float32) + b5_ref[...]

    # --- layer 6 (x2 already folded into w/b): (1,128) x (128,256) ------------
    o = jnp.dot(o, wl_ref[...], preferred_element_type=jnp.float32) + bl_ref[...]
    o_ref[...] = o.astype(o_ref.dtype)


def model_with_different_tensor_sizes(i, params):
    """i: (2,) f32 -> (256,) f32, matching the torch module's forward."""
    w0_s, b0_s, w_mid, b_mid, w5, b5, w_last, b_last = params
    smem = pltpu.MemorySpace.SMEM
    vmem = pltpu.MemorySpace.VMEM

    out_pad = pl.pallas_call(
        _mlp_chain_kernel,
        out_shape=jax.ShapeDtypeStruct((1, N_LAST), jnp.float32),
        in_specs=[
            pl.BlockSpec(memory_space=smem),   # x      (2,)
            pl.BlockSpec(memory_space=smem),   # w0     (8,)
            pl.BlockSpec(memory_space=smem),   # b0     (4,)
            pl.BlockSpec(memory_space=vmem),   # w_mid  (4,32,128)
            pl.BlockSpec(memory_space=vmem),   # b_mid  (4,128)
            pl.BlockSpec(memory_space=vmem),   # w5     (64,128)
            pl.BlockSpec(memory_space=vmem),   # b5     (1,128)
            pl.BlockSpec(memory_space=vmem),   # w_last (128,256)
            pl.BlockSpec(memory_space=vmem),   # b_last (1,256)
        ],
        out_specs=pl.BlockSpec(memory_space=vmem),
    )(i, w0_s, b0_s, w_mid, b_mid, w5, b5, w_last, b_last)

    return out_pad[0]                          # (256,)


def init_params(key):
    """Deterministic torch-style Linear init, packed into tight padded slabs."""
    raw_ws, raw_bs = [], []
    for fin, fout in zip(IN_SIZES, OUT_SIZES):
        key, kw, kb = jax.random.split(key, 3)
        bound = 1.0 / np.sqrt(fin)
        w = np.asarray(jax.random.uniform(kw, (fout, fin), jnp.float32, -bound, bound))
        b = np.asarray(jax.random.uniform(kb, (fout,), jnp.float32, -bound, bound))
        raw_ws.append(w)
        raw_bs.append(b)

    # Layer 0 -> SMEM scalars, stored (in, out) row-major.
    w0_s = np.ascontiguousarray(raw_ws[0].T).reshape(-1).astype(np.float32)   # (8,)
    b0_s = raw_bs[0].astype(np.float32)                                       # (4,)

    # Layers 1..4 -> (4, 32, 128) slab, stored (in, out), zero padded.
    w_mid = np.zeros((4, K_MID, N_MID), np.float32)
    b_mid = np.zeros((4, N_MID), np.float32)
    for idx, layer in enumerate(range(1, 5)):
        fin, fout = IN_SIZES[layer], OUT_SIZES[layer]
        w_mid[idx, :fin, :fout] = raw_ws[layer].T
        b_mid[idx, :fout] = raw_bs[layer]

    # Layer 5 -> (64, 128), no padding needed.
    w5 = np.ascontiguousarray(raw_ws[5].T).astype(np.float32)                 # (64, 128)
    b5 = raw_bs[5].reshape(1, N_L5).astype(np.float32)

    # Layer 6 with the final x2 (chain + chain) folded in -> (128, 256).
    w_last = (2.0 * raw_ws[6].T).astype(np.float32)                           # (128, 256)
    b_last = (2.0 * raw_bs[6]).reshape(1, N_LAST).astype(np.float32)

    params = (jnp.asarray(w0_s), jnp.asarray(b0_s),
              jnp.asarray(w_mid), jnp.asarray(b_mid),
              jnp.asarray(w5), jnp.asarray(b5),
              jnp.asarray(w_last), jnp.asarray(b_last))
    return params, raw_ws, raw_bs


def reference_forward(i, raw_ws, raw_bs):
    """Pure-JAX reference matching torch semantics (chain run twice and added)."""
    def chain(v):
        o = v
        for w, b in zip(raw_ws, raw_bs):
            o = jnp.asarray(w) @ o + jnp.asarray(b)
        return o
    return chain(i) + chain(i)


if __name__ == "__main__":
    key = jax.random.PRNGKey(0)
    key, k_in = jax.random.split(key)
    i = jax.random.normal(k_in, (2,), jnp.float32)   # torch: torch.randn(2)

    params, raw_ws, raw_bs = init_params(key)

    out = model_with_different_tensor_sizes(i, params)
    out = jax.block_until_ready(out)

    ref = reference_forward(i, raw_ws, raw_bs)
    assert out.shape == (256,), out.shape
    assert np.allclose(np.asarray(out), np.asarray(ref), rtol=1e-4, atol=1e-4)

    print("KERNEL_OK")
</pallas_src>

<mosaic_0001>
module attributes {stable_mosaic.version = 11 : i64} {
  func.func @_mlp_chain_kernel(%arg0: memref<2xf32, #tpu.memory_space<smem>>, %arg1: memref<8xf32, #tpu.memory_space<smem>>, %arg2: memref<4xf32, #tpu.memory_space<smem>>, %arg3: memref<4x32x128xf32, #tpu.memory_space<vmem>>, %arg4: memref<4x128xf32, #tpu.memory_space<vmem>>, %arg5: memref<64x128xf32, #tpu.memory_space<vmem>>, %arg6: memref<1x128xf32, #tpu.memory_space<vmem>>, %arg7: memref<128x256xf32, #tpu.memory_space<vmem>>, %arg8: memref<1x256xf32, #tpu.memory_space<vmem>>, %arg9: memref<1x256xf32, #tpu.memory_space<vmem>>) attributes {dimension_semantics = [], scalar_prefetch = 0 : i64, scratch_operands = 0 : i64, tpu.core_type = #tpu.core_type<tc>} {
    %c0 = arith.constant 0 : index
    %0 = memref.load %arg0[%c0] : memref<2xf32, #tpu.memory_space<smem>>
    %c1 = arith.constant 1 : index
    %1 = memref.load %arg0[%c1] : memref<2xf32, #tpu.memory_space<smem>>
    %c0_0 = arith.constant 0 : index
    %2 = memref.load %arg1[%c0_0] : memref<8xf32, #tpu.memory_space<smem>>
    %3 = arith.mulf %0, %2 : f32
    %c4 = arith.constant 4 : index
    %4 = memref.load %arg1[%c4] : memref<8xf32, #tpu.memory_space<smem>>
    %5 = arith.mulf %1, %4 : f32
    %6 = arith.addf %3, %5 : f32
    %c0_1 = arith.constant 0 : index
    %7 = memref.load %arg2[%c0_1] : memref<4xf32, #tpu.memory_space<smem>>
    %8 = arith.addf %6, %7 : f32
    %c1_2 = arith.constant 1 : index
    %9 = memref.load %arg1[%c1_2] : memref<8xf32, #tpu.memory_space<smem>>
    %10 = arith.mulf %0, %9 : f32
    %c5 = arith.constant 5 : index
    %11 = memref.load %arg1[%c5] : memref<8xf32, #tpu.memory_space<smem>>
    %12 = arith.mulf %1, %11 : f32
    %13 = arith.addf %10, %12 : f32
    %c1_3 = arith.constant 1 : index
    %14 = memref.load %arg2[%c1_3] : memref<4xf32, #tpu.memory_space<smem>>
    %15 = arith.addf %13, %14 : f32
    %c2 = arith.constant 2 : index
    %16 = memref.load %arg1[%c2] : memref<8xf32, #tpu.memory_space<smem>>
    %17 = arith.mulf %0, %16 : f32
    %c6 = arith.constant 6 : index
    %18 = memref.load %arg1[%c6] : memref<8xf32, #tpu.memory_space<smem>>
    %19 = arith.mulf %1, %18 : f32
    %20 = arith.addf %17, %19 : f32
    %c2_4 = arith.constant 2 : index
    %21 = memref.load %arg2[%c2_4] : memref<4xf32, #tpu.memory_space<smem>>
    %22 = arith.addf %20, %21 : f32
    %c3 = arith.constant 3 : index
    %23 = memref.load %arg1[%c3] : memref<8xf32, #tpu.memory_space<smem>>
    %24 = arith.mulf %0, %23 : f32
    %c7 = arith.constant 7 : index
    %25 = memref.load %arg1[%c7] : memref<8xf32, #tpu.memory_space<smem>>
    %26 = arith.mulf %1, %25 : f32
    %27 = arith.addf %24, %26 : f32
    %c3_5 = arith.constant 3 : index
    %28 = memref.load %arg2[%c3_5] : memref<4xf32, #tpu.memory_space<smem>>
    %29 = arith.addf %27, %28 : f32
    %c0_6 = arith.constant 0 : index
    %c0_7 = arith.constant 0 : index
    %c0_8 = arith.constant 0 : index
    %30 = vector.load %arg3[%c0_6, %c0_7, %c0_8] : memref<4x32x128xf32, #tpu.memory_space<vmem>>, vector<1x32x128xf32>
    %31 = vector.shape_cast %30 : vector<1x32x128xf32> to vector<32x128xf32>
    %c0_9 = arith.constant 0 : index
    %c0_10 = arith.constant 0 : index
    %32 = vector.load %arg4[%c0_9, %c0_10] : memref<4x128xf32, #tpu.memory_space<vmem>>, vector<1x128xf32>
    %33 = vector.extract_strided_slice %31 {offsets = [0, 0], sizes = [1, 128], strides = [1, 1]} : vector<32x128xf32> to vector<1x128xf32>
    %34 = vector.broadcast %8 : f32 to vector<1x128xf32>
    %35 = arith.mulf %34, %33 : vector<1x128xf32>
    %36 = arith.addf %32, %35 : vector<1x128xf32>
    %37 = vector.extract_strided_slice %31 {offsets = [1, 0], sizes = [1, 128], strides = [1, 1]} : vector<32x128xf32> to vector<1x128xf32>
    %38 = vector.broadcast %15 : f32 to vector<1x128xf32>
    %39 = arith.mulf %38, %37 : vector<1x128xf32>
    %40 = arith.addf %36, %39 : vector<1x128xf32>
    %41 = vector.extract_strided_slice %31 {offsets = [2, 0], sizes = [1, 128], strides = [1, 1]} : vector<32x128xf32> to vector<1x128xf32>
    %42 = vector.broadcast %22 : f32 to vector<1x128xf32>
    %43 = arith.mulf %42, %41 : vector<1x128xf32>
    %44 = arith.addf %40, %43 : vector<1x128xf32>
    %45 = vector.extract_strided_slice %31 {offsets = [3, 0], sizes = [1, 128], strides = [1, 1]} : vector<32x128xf32> to vector<1x128xf32>
    %46 = vector.broadcast %29 : f32 to vector<1x128xf32>
    %47 = arith.mulf %46, %45 : vector<1x128xf32>
    %48 = arith.addf %44, %47 : vector<1x128xf32>
    %49 = vector.extract_strided_slice %48 {offsets = [0, 0], sizes = [1, 32], strides = [1, 1]} : vector<1x128xf32> to vector<1x32xf32>
    %c1_11 = arith.constant 1 : index
    %c0_12 = arith.constant 0 : index
    %c0_13 = arith.constant 0 : index
    %50 = vector.load %arg3[%c1_11, %c0_12, %c0_13] : memref<4x32x128xf32, #tpu.memory_space<vmem>>, vector<1x32x128xf32>
    %51 = vector.shape_cast %50 : vector<1x32x128xf32> to vector<32x128xf32>
    %cst = arith.constant dense<0.000000e+00> : vector<1x128xf32>
    %52 = tpu.matmul %49, %51, %cst {dimension_numbers = #tpu.dot_dimension_numbers<[1], [0], [0], [1], [0, 0, 1, 1], [], []>} : vector<1x32xf32>, vector<32x128xf32>, vector<1x128xf32> -> vector<1x128xf32>
    %c1_14 = arith.constant 1 : index
    %c0_15 = arith.constant 0 : index
    %53 = vector.load %arg4[%c1_14, %c0_15] : memref<4x128xf32, #tpu.memory_space<vmem>>, vector<1x128xf32>
    %54 = arith.addf %52, %53 : vector<1x128xf32>
    %55 = vector.extract_strided_slice %54 {offsets = [0, 0], sizes = [1, 32], strides = [1, 1]} : vector<1x128xf32> to vector<1x32xf32>
    %c2_16 = arith.constant 2 : index
    %c0_17 = arith.constant 0 : index
    %c0_18 = arith.constant 0 : index
    %56 = vector.load %arg3[%c2_16, %c0_17, %c0_18] : memref<4x32x128xf32, #tpu.memory_space<vmem>>, vector<1x32x128xf32>
    %57 = vector.shape_cast %56 : vector<1x32x128xf32> to vector<32x128xf32>
    %cst_19 = arith.constant dense<0.000000e+00> : vector<1x128xf32>
    %58 = tpu.matmul %55, %57, %cst_19 {dimension_numbers = #tpu.dot_dimension_numbers<[1], [0], [0], [1], [0, 0, 1, 1], [], []>} : vector<1x32xf32>, vector<32x128xf32>, vector<1x128xf32> -> vector<1x128xf32>
    %c2_20 = arith.constant 2 : index
    %c0_21 = arith.constant 0 : index
    %59 = vector.load %arg4[%c2_20, %c0_21] : memref<4x128xf32, #tpu.memory_space<vmem>>, vector<1x128xf32>
    %60 = arith.addf %58, %59 : vector<1x128xf32>
    %61 = vector.extract_strided_slice %60 {offsets = [0, 0], sizes = [1, 32], strides = [1, 1]} : vector<1x128xf32> to vector<1x32xf32>
    %c3_22 = arith.constant 3 : index
    %c0_23 = arith.constant 0 : index
    %c0_24 = arith.constant 0 : index
    %62 = vector.load %arg3[%c3_22, %c0_23, %c0_24] : memref<4x32x128xf32, #tpu.memory_space<vmem>>, vector<1x32x128xf32>
    %63 = vector.shape_cast %62 : vector<1x32x128xf32> to vector<32x128xf32>
    %cst_25 = arith.constant dense<0.000000e+00> : vector<1x128xf32>
    %64 = tpu.matmul %61, %63, %cst_25 {dimension_numbers = #tpu.dot_dimension_numbers<[1], [0], [0], [1], [0, 0, 1, 1], [], []>} : vector<1x32xf32>, vector<32x128xf32>, vector<1x128xf32> -> vector<1x128xf32>
    %c3_26 = arith.constant 3 : index
    %c0_27 = arith.constant 0 : index
    %65 = vector.load %arg4[%c3_26, %c0_27] : memref<4x128xf32, #tpu.memory_space<vmem>>, vector<1x128xf32>
    %66 = arith.addf %64, %65 : vector<1x128xf32>
    %67 = vector.extract_strided_slice %66 {offsets = [0, 0], sizes = [1, 64], strides = [1, 1]} : vector<1x128xf32> to vector<1x64xf32>
    %c0_28 = arith.constant 0 : index
    %c0_29 = arith.constant 0 : index
    %68 = vector.load %arg5[%c0_28, %c0_29] : memref<64x128xf32, #tpu.memory_space<vmem>>, vector<64x128xf32>
    %cst_30 = arith.constant dense<0.000000e+00> : vector<1x128xf32>
    %69 = tpu.matmul %67, %68, %cst_30 {dimension_numbers = #tpu.dot_dimension_numbers<[1], [0], [0], [1], [0, 0, 1, 1], [], []>} : vector<1x64xf32>, vector<64x128xf32>, vector<1x128xf32> -> vector<1x128xf32>
    %c0_31 = arith.constant 0 : index
    %c0_32 = arith.constant 0 : index
    %70 = vector.load %arg6[%c0_31, %c0_32] : memref<1x128xf32, #tpu.memory_space<vmem>>, vector<1x128xf32>
    %71 = arith.addf %69, %70 : vector<1x128xf32>
    %c0_33 = arith.constant 0 : index
    %c0_34 = arith.constant 0 : index
    %72 = vector.load %arg7[%c0_33, %c0_34] : memref<128x256xf32, #tpu.memory_space<vmem>>, vector<128x256xf32>
    %cst_35 = arith.constant dense<0.000000e+00> : vector<1x256xf32>
    %73 = tpu.matmul %71, %72, %cst_35 {dimension_numbers = #tpu.dot_dimension_numbers<[1], [0], [0], [1], [0, 0, 1, 1], [], []>} : vector<1x128xf32>, vector<128x256xf32>, vector<1x256xf32> -> vector<1x256xf32>
    %c0_36 = arith.constant 0 : index
    %c0_37 = arith.constant 0 : index
    %74 = vector.load %arg8[%c0_36, %c0_37] : memref<1x256xf32, #tpu.memory_space<vmem>>, vector<1x256xf32>
    %75 = arith.addf %73, %74 : vector<1x256xf32>
    %c0_38 = arith.constant 0 : index
    %c0_39 = arith.constant 0 : index
    %76 = vector.load %arg9[%c0_38, %c0_39] : memref<1x256xf32, #tpu.memory_space<vmem>>, vector<1x256xf32>
    tpu.vector_store %arg9[%c0_38, %c0_39], %75 {strides = array<i32>} : memref<1x256xf32, #tpu.memory_space<vmem>>, vector<1x256xf32>,
    return
  }
}

</mosaic_0001>

<bundles_post_ra>
// kernel: tpu_custom_call.1
= control target key start
LH: loop header
LB: loop body
LE: loop exit
PB: predicated region body
PF: predicated region fallthrough
CT: control target
= control target key end

     0   :  { %14 = vsyncpa [#allocation5], 0  ;;  %s720_s0 = inlined_call_operand.hbm [shape: f32[2], index: 0, kind: input, shape index: {}]   ;;  %s721_s1 = inlined_call_operand.hbm [shape: f32[8], index: 1, kind: input, shape index: {}]   ;;  %s722_s2 = inlined_call_operand.vmem [shape: f32[4], index: 2, kind: input, shape index: {}]   ;;  %s723_s3 = inlined_call_operand.hbm [shape: f32[4,32,128], index: 3, kind: input, shape index: {}]   ;;  %s724_s4 = inlined_call_operand.hbm [shape: f32[4,128], index: 4, kind: input, shape index: {}]   ;;  %s725_s5 = inlined_call_operand.hbm [shape: f32[64,128], index: 5, kind: input, shape index: {}]   ;;  %s726_s6 = inlined_call_operand.vmem [shape: f32[1,128], index: 6, kind: input, shape index: {}]   ;;  %s727_s7 = inlined_call_operand.hbm [shape: f32[128,256], index: 7, kind: input, shape index: {}]   ;;  %s728_s8 = inlined_call_operand.vmem [shape: f32[1,256], index: 8, kind: input, shape index: {}]   ;;  %s729_s9 = inlined_call_operand.hbm [shape: f32[1,256], index: 9, kind: output, shape index: {}]  }
   0x1   :  { %15 = vsyncpa [#allocation8], 0 }
   0x2   :  { %16 = vsyncpa [#allocation6], 0 }
   0x3   :  { %17 = vsyncpa [#allocation3], 0 }
   0x4   :  { %18 = vsyncpa [#allocation12], 0 }
   0x5   :  { %19 = vsyncpa [#allocation15], 0  ;;  %s66_s11 = sshll.u32 %s724_s4, 4  ;;  %s67_s11 = int_to_ptr.hbm [resolvable:$true] %s66_s11 }
   0x6   :  { %20 = vsyncpa [#allocation4], 0  ;;  %s613_s12 = smov [#allocation11]   ;;  %s26_s16 = sshll.u32 %s720_s0, 4  ;;  %s27_s16 = int_to_ptr.hbm [resolvable:$true] %s26_s16 }
   0x7   :  { %s68_s13 = sshll.u32 %s613_s12, 4  ;;  %s614_s17 = smov [#allocation2]   ;;  %s69_s13 = int_to_ptr.vmem [resolvable:$true] %s68_s13 }
   0x8   :  { %71 = dma.hbm_to_vmem [thread:$0]  %s67_s11, 64, %s69_s13, [#allocation12]  }
   0x9   :  { %29 = dma.hbm_to_smem %s27_s16, 16, %s614_s17, [#allocation5]  }
   0xa   :  { %s35_s20 = sshll.u32 %s721_s1, 4  ;;  %s44_s22 = sshll.u32 %s722_s2, 4  ;;  %s36_s20 = int_to_ptr.hbm [resolvable:$true] %s35_s20  ;;  %s45_s22 = int_to_ptr.vmem [resolvable:$true] %s44_s22 }
   0xb   :  { %s615_s23 = smov [#allocation7]   ;;  %s616_s24 = smov [#allocation9]  }
   0xc   :  { %38 = dma.hbm_to_smem %s36_s20, 16, %s615_s23, [#allocation8]  }
   0xd   :  { %47 = dma.vmem_to_smem %s45_s22, 16, %s616_s24, [#allocation6]  }
   0xe   :  { %s52_s26 = sshll.u32 %s723_s3, 4  ;;  %s617_s27 = smov [#allocation10]   ;;  %s53_s26 = int_to_ptr.hbm [resolvable:$true] %s52_s26 }
   0xf   :  { %s54_s28 = sshll.u32 %s617_s27, 4  ;;  %s76_s30 = sshll.u32 %s725_s5, 4  ;;  %s55_s28 = int_to_ptr.vmem [resolvable:$true] %s54_s28  ;;  %s77_s30 = int_to_ptr.hbm [resolvable:$true] %s76_s30 }
  0x10   :  { %s618_s10 = smov 128   ;;  %s619_s11 = smov 8  }
  0x11   :  { %60 = dma.hbm_to_vmem [thread:$0]  %s53_s26, 2048, %s55_s28, [#allocation3], %s618_s10, %s618_s10, %s619_s11  }
  0x12   :  { %s620_s2 = smov [#allocation13]   ;;  %s91_s15 = sshll.u32 %s727_s7, 4  ;;  %s92_s15 = int_to_ptr.hbm [resolvable:$true] %s91_s15 }
  0x13   :  { %s78_s12 = sshll.u32 %s620_s2, 4  ;;  %s621_s3 = smov [#allocation14]   ;;  %s79_s12 = int_to_ptr.vmem [resolvable:$true] %s78_s12 }
  0x14   :  { %84 = dma.hbm_to_vmem [thread:$0]  %s77_s30, 1024, %s79_s12, [#allocation12], %s618_s10, %s618_s10, %s619_s11  }
  0x15   :  { %s93_s16 = sshll.u32 %s621_s3, 4  ;;  %s622_s17 = smov 256   ;;  %s94_s16 = int_to_ptr.vmem [resolvable:$true] %s93_s16 }
  0x16   :  { %s623_s18 = smov 16  }
  0x17   :  { %99 = dma.hbm_to_vmem [thread:$0]  %s92_s15, 4096, %s94_s16, [#allocation15], %s622_s17, %s622_s17, %s623_s18  }
  0x18   :  { %599 = dma.done.wait [#allocation5], 16  }
  0x19   :  { %600 = vsyncadd [#allocation5], 4294967280 }
  0x1a   :  { %601 = dma.done.wait [#allocation8], 16  }
  0x1b   :  { %602 = vsyncadd [#allocation8], 4294967280 }
  0x1c   :  { %603 = dma.done.wait [#allocation6], 16  }
  0x1d   :  { %604 = vsyncadd [#allocation6], 4294967280 }
  0x1e   :  { %605 = dma.done.wait [#allocation3], 2048  }
  0x1f   :  { %606 = vsyncadd [#allocation3], 4294965248 }
  0x20   :  { %607 = dma.done.wait [#allocation12], 1088  }
  0x21   :  { %608 = vsyncadd [#allocation12], 4294966208 }
  0x22   :  { %609 = dma.done.wait [#allocation15], 4096  }
  0x23   :  { %610 = vsyncadd [#allocation15], 4294963200 }
  0x24   :  { %130 = sfence }
  0x25   :  { %v188_v0 = vld [vmem:[#allocation10 + $0x38] sm:$0xff]  ;;  %v187_v1 = vld [vmem:[#allocation10 + $0x30] sm:$0xff]  ;;  %s696_s5 = sld [smem:[#allocation2]]  ;;  %v186_v2 = vld [vmem:[#allocation10 + $0x28] sm:$0xff]  ;;  %vm190_vm0 = vcmask 261120   ;;  %vm281_vm1 = vcmask 523264  }
  0x26   :  { %206 = vmatpush.msra.mxu2 %v188_v0  ;;  %s698_s7 = sld [smem:[#allocation2 + $0x1]]  ;;  %v185_v3 = vld [vmem:[#allocation10 + $0x20] sm:$0xff]  ;;  %v218_v4 = vld [vmem:[#allocation10 + $0x58] sm:$0xff]  ;;  %v217_v5 = vld [vmem:[#allocation10 + $0x50] sm:$0xff]  ;;  %vm386_vm2 = vcmask 1040384  }
  0x27   :  { %s133_s19 = sld [smem:[#allocation7]]  ;;  %v216_v6 = vld [vmem:[#allocation10 + $0x48] sm:$0xff]  ;;  %v161_v7 = vld [vmem:[#allocation10] sm:$0xff]  ;;  %v247_v25 = vld [vmem:[#allocation10 + $0x78] sm:$0xff] }
  0x28   :  { %207 = vmatpush.msra.mxu2 %v187_v1  ;;  %s417_s20 = sld [smem:[#allocation7 + $0x4]]  ;;  %v162_v10 = vld [vmem:[#allocation11] sm:$0x1]  ;;  %v246_v26 = vld [vmem:[#allocation10 + $0x70] sm:$0xff]  ;;  %v245_v27 = vld [vmem:[#allocation10 + $0x68] sm:$0xff] }
  0x29   :  { %s138_s21 = sld [smem:[#allocation9]]  ;;  %v215_v24 = vld [vmem:[#allocation10 + $0x40] sm:$0xff]  ;;  %v278_v33 = vld [vmem:[#allocation13 + $0x30] sm:$0xff]  ;;  %v277_v34 = vld [vmem:[#allocation13 + $0x28] sm:$0xff] }
  0x2a   :  { %208 = vmatpush.msra.mxu2 %v186_v2  ;;  %s418_s4 = sld [smem:[#allocation7 + $0x1]]  ;;  %v189_v28 = vld [vmem:[#allocation11 + $0x1] sm:$0x1]  ;;  %v276_v35 = vld [vmem:[#allocation13 + $0x20] sm:$0xff]  ;;  %v274_v37 = vld [vmem:[#allocation13 + $0x10] sm:$0xff] }
  0x2b   :  { %s419_s22 = sld [smem:[#allocation7 + $0x5]]  ;;  %v244_v31 = vld [vmem:[#allocation10 + $0x60] sm:$0xff]  ;;  %v273_v41 = vld [vmem:[#allocation13 + $0x8] sm:$0xff]  ;;  %v335_v43 = vld [vmem:[#allocation14 + $0xf0] sm:$0xff] }
  0x2c   :  { %209 = vmatpush.msra.mxu2 %v185_v3  ;;  %s420_s23 = sld [smem:[#allocation9 + $0x1]]  ;;  %v279_v32 = vld [vmem:[#allocation13 + $0x38] sm:$0xff]  ;;  %v272_v42 = vld [vmem:[#allocation13] sm:$0xff]  ;;  %343 = vmatpush.msra.mxu0 %v335_v43  ;;  %v334_v46 = vld [vmem:[#allocation14 + $0xe8] sm:$0xff] }
  0x2d   :  { %s134_s24 = smul.f32 %s133_s19, %s696_s5  ;;  %s421_s25 = sld [smem:[#allocation7 + $0x2]]  ;;  %293 = vmatpush.msra.mxu3 %v279_v32  ;;  %v275_v36 = vld [vmem:[#allocation13 + $0x18] sm:$0xff]  ;;  %v333_v45 = vld [vmem:[#allocation14 + $0xe0] sm:$0xff]  ;;  %v331_v47 = vld [vmem:[#allocation14 + $0xd0] sm:$0xff] }
  0x2e   :  { %235 = vmatpush.msrb.mxu2 %v218_v4  ;;  %s136_s0 = smul.f32 %s417_s20, %s698_s7  ;;  %s422_s26 = sld [smem:[#allocation7 + $0x6]]  ;;  %v219_v38 = vld [vmem:[#allocation11 + $0x2] sm:$0x1]  ;;  %344 = vmatpush.msra.mxu0 %v333_v45  ;;  %v329_v49 = vld [vmem:[#allocation14 + $0xc0] sm:$0xff]  ;;  %v330_v50 = vld [vmem:[#allocation14 + $0xc8] sm:$0xff] }
  0x2f   :  { %s423_s27 = sld [smem:[#allocation9 + $0x2]]  ;;  %294 = vmatpush.msra.mxu3 %v278_v33  ;;  %v336_v44 = vld [vmem:[#allocation14 + $0xf8] sm:$0xff]  ;;  %v327_v51 = vld [vmem:[#allocation14 + $0xb0] sm:$0xff]  ;;  %v325_v53 = vld [vmem:[#allocation14 + $0xa0] sm:$0xff] }
  0x30   :  { %236 = vmatpush.msrb.mxu2 %v217_v5  ;;  %s137_s28 = sadd.f32 %s136_s0, %s134_s24  ;;  %s141_s29 = smul.f32 %s418_s4, %s696_s5  ;;  %363 = vmatpush.msra.mxu1 %v336_v44  ;;  %v332_v48 = vld [vmem:[#allocation14 + $0xd8] sm:$0xff]  ;;  %v326_v54 = vld [vmem:[#allocation14 + $0xa8] sm:$0xff]  ;;  %v323_v55 = vld [vmem:[#allocation14 + $0x90] sm:$0xff] }
  0x31   :  { %s143_s1 = smul.f32 %s419_s22, %s698_s7  ;;  %s424_s30 = sld [smem:[#allocation7 + $0x3]]  ;;  %295 = vmatpush.msra.mxu3 %v277_v34  ;;  %345 = vmatpush.msra.mxu0 %v331_v47  ;;  %v328_v52 = vld [vmem:[#allocation14 + $0xb8] sm:$0xff]  ;;  %v321_v57 = vld [vmem:[#allocation14 + $0x80] sm:$0xff]  ;;  %v322_v58 = vld [vmem:[#allocation14 + $0x88] sm:$0xff] }
  0x32   :  { %237 = vmatpush.msrb.mxu2 %v216_v6  ;;  %s139_s10 = sadd.f32 %s138_s21, %s137_s28  ;;  %364 = vmatpush.msra.mxu1 %v334_v46  ;;  %v324_v56 = vld [vmem:[#allocation14 + $0x98] sm:$0xff]  ;;  %v319_v59 = vld [vmem:[#allocation14 + $0x70] sm:$0xff]  ;;  %v317_v61 = vld [vmem:[#allocation14 + $0x60] sm:$0xff]  ;;  %s624_s22 = smov [#allocation16]  }
  0x33   :  { %s144_s11 = sadd.f32 %s143_s1, %s141_s29  ;;  %s148_s2 = smul.f32 %s421_s25, %s696_s5  ;;  %296 = vmatpush.msra.mxu3 %v276_v35  ;;  %346 = vmatpush.msra.mxu0 %v329_v49  ;;  %v320_v60 = vld [vmem:[#allocation14 + $0x78] sm:$0xff]  ;;  %v318_v62 = vld [vmem:[#allocation14 + $0x68] sm:$0xff]  ;;  %v315_v63 = vld [vmem:[#allocation14 + $0x50] sm:$0xff] }
  0x34   :  { %s150_s12 = smul.f32 %s422_s26, %s698_s7  ;;  %s425_s13 = sld [smem:[#allocation7 + $0x7]]  ;;  %v163_v8 = vstv %s139_s10  ;;  %238 = vmatpush.msrb.mxu2 %v215_v24  ;;  %365 = vmatpush.msra.mxu1 %v332_v48  ;;  %v316_v0 = vld [vmem:[#allocation14 + $0x58] sm:$0xff]  ;;  %v313_v1 = vld [vmem:[#allocation14 + $0x40] sm:$0xff]  ;;  %v314_v2 = vld [vmem:[#allocation14 + $0x48] sm:$0xff] }
  0x35   :  { %s146_s14 = sadd.f32 %s420_s23, %s144_s11  ;;  %v164_v9 = vmul.f32 %v163_v8, %v161_v7  ;;  %297 = vmatpush.msra.mxu3 %v275_v36  ;;  %347 = vmatpush.msra.mxu0 %v327_v51  ;;  %v311_v3 = vld [vmem:[#allocation14 + $0x30] sm:$0xff]  ;;  %v312_v4 = vld [vmem:[#allocation14 + $0x38] sm:$0xff]  ;;  %v309_v5 = vld [vmem:[#allocation14 + $0x20] sm:$0xff]  ;;  %s399_s23 = sshll.u32 %s624_s22, 4  ;;  %s400_s23 = int_to_ptr.vmem [resolvable:$true] %s399_s23 }
  0x36   :  { %s151_s15 = sadd.f32 %s150_s12, %s148_s2  ;;  %366 = vmatpush.msra.mxu1 %v330_v50  ;;  %v310_v6 = vld [vmem:[#allocation14 + $0x28] sm:$0xff] }
  0x37   :  { %s426_s3 = sld [smem:[#allocation9 + $0x3]]  ;;  %v166_v11 = vstv %s146_s14  ;;  %s155_s17 = smul.f32 %s424_s30, %s696_s5  ;;  %v165_v13 = vadd.f32 %v164_v9, %v162_v10  ;;  %298 = vmatpush.msra.mxu3 %v274_v37  ;;  %348 = vmatpush.msra.mxu0 %v325_v53  ;;  %v307_v10 = vld [vmem:[#allocation14 + $0x10] sm:$0xff] }
  0x38   :  { %s153_s16 = sadd.f32 %s423_s27, %s151_s15  ;;  %v167_v12 = vmul.f32 %v166_v11, %v161_v7  ;;  %367 = vmatpush.msra.mxu1 %v328_v52  ;;  %v308_v11 = vld [vmem:[#allocation14 + $0x18] sm:$0xff] }
  0x39   :  { %299 = vmatpush.msra.mxu3 %v273_v41  ;;  %349 = vmatpush.msra.mxu0 %v323_v55 }
  0x3a   :  { %s157_s18 = smul.f32 %s425_s13, %s698_s7  ;;  %v169_v14 = vrot.slane %v167_v12, 1  ;;  %v172_v15 = vstv %s153_s16  ;;  %368 = vmatpush.msra.mxu1 %v326_v54  ;;  %v305_v12 = vld [vmem:[#allocation14] sm:$0xff] }
  0x3b   :  { %v173_v16 = vmul.f32 %v172_v15, %v161_v7  ;;  %300 = vmatpush.msra.mxu3 %v272_v42  ;;  %350 = vmatpush.msra.mxu0 %v321_v57 }
  0x3c   :  { %s158_s19 = sadd.f32 %s157_s18, %s155_s17  ;;  %v171_v17 = vadd.f32 %v169_v14, %v165_v13  ;;  %369 = vmatpush.msra.mxu1 %v324_v56  ;;  %v306_v13 = vld [vmem:[#allocation14 + $0x8] sm:$0xff]  ;;  %v280_v14 = vld [vmem:[%s726_s6] sm:$0x1]  ;;  %s401_s6 = sshll.u32 %s729_s9, 4  ;;  %s402_s6 = int_to_ptr.hbm [resolvable:$true] %s401_s6 }
  0x3d   :  { %v175_v18 = vrot.slane %v173_v16, 2  ;;  %351 = vmatpush.msra.mxu0 %v319_v59 }
  0x3e   :  { %s160_s20 = sadd.f32 %s426_s3, %s158_s19  ;;  %370 = vmatpush.msra.mxu1 %v322_v58 }
  0x3f   :  { %v177_v20 = vadd.f32 %v175_v18, %v171_v17  ;;  %352 = vmatpush.msra.mxu0 %v317_v61  ;;  %v337_v17 = vld [vmem:[%s728_s8] sm:$0x3] }
  0x40   :  { %v178_v19 = vstv %s160_s20  ;;  %371 = vmatpush.msra.mxu1 %v320_v60  ;;  %v340_v18 = vperm.slane %v337_v17, 1 }
  0x41   :  { %v179_v21 = vmul.f32 %v178_v19, %v161_v7  ;;  %353 = vmatpush.msra.mxu0 %v315_v63  ;;  %v248_v7 = vld [vmem:[#allocation11 + $0x3] sm:$0x1]  ;;  %v339_v19 = vperm.slane %v337_v17, 0 }
  0x42   :  { %372 = vmatpush.msra.mxu1 %v318_v62 }
  0x43   :  { %v181_v22 = vrot.slane %v179_v21, 3  ;;  %354 = vmatpush.msra.mxu0 %v313_v1 }
  0x44   :  { %373 = vmatpush.msra.mxu1 %v316_v0 }
  0x45   :  { %v183_v23 = vadd.f32 %v181_v22, %v177_v20  ;;  %355 = vmatpush.msra.mxu0 %v311_v3  ;;  %v389_v20 = vlaneseq }
  0x46   :  { %374 = vmatpush.msra.mxu1 %v314_v2 }
  0x47   :  { %427 = vmatmul.msk.f32.vlgmr.msra.gmra.mxu2 %vm190_vm0, %v183_v23  ;;  %356 = vmatpush.msra.mxu0 %v309_v5  ;;  %vm391_vm3 = vcmp.lt.s32.totalorder %v389_v20, 256 }
  0x48   :  { %264 = vmatpush.msra.mxu2 %v247_v25  ;;  %375 = vmatpush.msra.mxu1 %v312_v4 }
  0x49   :  { %357 = vmatpush.msra.mxu0 %v307_v10 }
  0x4a   :  { %265 = vmatpush.msra.mxu2 %v246_v26  ;;  %376 = vmatpush.msra.mxu1 %v310_v6 }
  0x4b   :  { %358 = vmatpush.msra.mxu0 %v305_v12 }
  0x4c   :  { %266 = vmatpush.msra.mxu2 %v245_v27  ;;  %377 = vmatpush.msra.mxu1 %v308_v11 }
  0x4e   :  { %267 = vmatpush.msra.mxu2 %v244_v31  ;;  %378 = vmatpush.msra.mxu1 %v306_v13 }
  0xca   :  { %v211_v29 = vpop.f32.mrf.mxu2 }
  0xcb   :  { %v212_v30 = vadd.f32 %v211_v29, %v189_v28 }
  0xcd   :  { %428 = vmatmul.msk.f32.vlgmr.msrb.gmra.mxu2 %vm190_vm0, %v212_v30 }
 0x150   :  { %v240_v39 = vpop.f32.mrf.mxu2 }
 0x151   :  { %v241_v40 = vadd.f32 %v240_v39, %v219_v38 }
 0x153   :  { %429 = vmatmul.msk.f32.vlgmr.msra.gmra.mxu2 %vm190_vm0, %v241_v40 }
 0x1d6   :  { %v269_v8 = vpop.f32.mrf.mxu2 }
 0x1d7   :  { %v270_v9 = vadd.f32 %v269_v8, %v248_v7 }
 0x1d9   :  { %430 = vmatmul.msk.f32.vlgmr.msra.gmra.mxu3 %vm281_vm1, %v270_v9 }
 0x25c   :  { %v302_v15 = vpop.f32.mrf.mxu3 }
 0x25d   :  { %v303_v16 = vadd.f32 %v302_v15, %v280_v14 }
 0x25f   :  { %359 = vmatmul.f32.vlgmr.msra.gmra.mxu0 %v303_v16  ;;  %379 = vmatmul.f32.vlgmr.msra.gmra.mxu1 %v303_v16 }
 0x2dc   :  { %v360_v21 = vpop.f32.mrf.mxu0  ;;  %v380_v22 = vpop.f32.mrf.mxu1 }
 0x2dd   :  { %v381_v23 = vadd.f32 %v380_v22, %v340_v18  ;;  %v361_v24 = vadd.f32 %v360_v21, %v339_v19 }
 0x2df   :  { %v385_v25 = vrot.slane %v381_v23, 7 }
 0x2e1   :  { %v387_v26 = vsel %vm386_vm2, %v361_v24, %v385_v25 }
 0x2e2   :  { %393 = vst.msk [vmem:[#allocation16] sm:$0x3] %vm391_vm3, %v387_v26 }
 0x2e3   :  { %404 = dma.vmem_to_hbm [thread:$0]  %s400_s23, 32, %s402_s6, [#allocation4]  }
 0x2e4   :  { %611 = dma.done.wait [#allocation4], 32  }
 0x2e5   :  { %612 = vsyncadd [#allocation4], 4294967264 }
 0x2e6   :  { %409 = vsyncpa [#allocation3], 1 }
 0x2e7   :  { %410 = vsyncpa [#allocation12], 1 }
 0x2e8   :  { %411 = vsyncpa [#allocation15], 1 }
 0x2e9   :  { %412 = vsyncpa [#allocation4], 1 }
 0x2ea   :  { %413 = vsyncpa [#allocation5], 1 }
 0x2eb   :  { %414 = vsyncpa [#allocation8], 1 }
 0x2ec   :  { %415 = vsyncpa [#allocation6], 1 }

</bundles_post_ra>
